<compile_context>
chip_gen: v5e
topology: v5e:2x2
jax: 0.10.0
libtpu: 0.0.40
codegen_flags: <defaults>
</compile_context>

<pallas_src>
import functools
import math

import jax
import jax.numpy as jnp
from jax.experimental import pallas as pl
from jax.experimental.pallas import tpu as pltpu


# ----------------------------------------------------------------------------
# Fused kernel: one-hot gather(h_table, t) -> Swish -> Linear(dim, dim)
# ----------------------------------------------------------------------------
def _time_embedding_kernel(t_ref, htab_ref, w2_ref, b2_ref, o_ref, *,
                           n_timesteps, matmul_dtype):
    bt = t_ref.shape[0]

    # Embedding lookup as a one-hot MXU matmul (exact: one-hot rows in f32).
    iota = jax.lax.broadcasted_iota(jnp.int32, (bt, n_timesteps), 1)
    onehot = (iota == t_ref[...]).astype(jnp.float32)          # (bt, T)
    h = jnp.dot(onehot, htab_ref[...],                          # == (table@W1+b1)[t]
                preferred_element_type=jnp.float32)             # (bt, dim) f32

    # Swish in f32 (VPU mul + EUP sigmoid).
    h = h * jax.nn.sigmoid(h)

    # Second Linear (optionally bf16 MXU inputs, f32 accumulation).
    y = jnp.dot(h.astype(matmul_dtype), w2_ref[...].astype(matmul_dtype),
                preferred_element_type=jnp.float32)
    o_ref[...] = (y + b2_ref[...]).astype(o_ref.dtype)


def time_embedding_forward(t, h_table, w2, b2, *, block_b=256,
                           matmul_dtype=jnp.float32):
    """Full TimeEmbedding forward.  t: (B,) int32.  Returns (B, dim) f32."""
    B = t.shape[0]
    T, dim = h_table.shape
    assert w2.shape == (dim, dim) and b2.shape == (dim,)

    bt = min(B, block_b)
    assert B % bt == 0, "batch must be a multiple of the batch tile"
    grid = (B // bt,)

    t2 = t.reshape(B, 1).astype(jnp.int32)
    b2_2d = b2.reshape(1, dim)

    kernel = functools.partial(_time_embedding_kernel,
                               n_timesteps=T, matmul_dtype=matmul_dtype)

    flops = 2 * B * T * dim + 2 * B * dim * dim + 4 * B * dim
    bytes_accessed = 4 * (B + T * dim + dim * dim + dim + B * dim)

    return pl.pallas_call(
        kernel,
        out_shape=jax.ShapeDtypeStruct((B, dim), jnp.float32),
        grid_spec=pltpu.PrefetchScalarGridSpec(
            num_scalar_prefetch=0,
            grid=grid,
            in_specs=[
                pl.BlockSpec((bt, 1), lambda i: (i, 0)),      # t (batch tile)
                # Same block every step -> resident in VMEM across the grid.
                pl.BlockSpec((T, dim), lambda i: (0, 0)),     # folded table
                pl.BlockSpec((dim, dim), lambda i: (0, 0)),   # W2
                pl.BlockSpec((1, dim), lambda i: (0, 0)),     # b2
            ],
            out_specs=pl.BlockSpec((bt, dim), lambda i: (i, 0)),
        ),
        compiler_params=pltpu.CompilerParams(
            dimension_semantics=("parallel",),                # batch tiles independent
        ),
        cost_estimate=pl.CostEstimate(
            flops=flops, transcendentals=B * dim, bytes_accessed=bytes_accessed),
    )(t2, h_table, w2, b2_2d)


# ----------------------------------------------------------------------------
# Parameter / table construction (matches the PyTorch __init__ exactly)
# ----------------------------------------------------------------------------
def make_sinusoidal_table(T, d_model):
    assert d_model % 2 == 0
    freqs = jnp.exp(
        -(jnp.arange(0, d_model, 2, dtype=jnp.float32) / d_model) * math.log(10000.0)
    )                                                    # (d_model//2,)
    pos = jnp.arange(T, dtype=jnp.float32)               # (T,)
    ang = pos[:, None] * freqs[None, :]                  # (T, d_model//2)
    emb = jnp.stack([jnp.sin(ang), jnp.cos(ang)], axis=-1)
    return emb.reshape(T, d_model)                       # interleaved sin/cos


def xavier_uniform(key, fan_in, fan_out):
    bound = math.sqrt(6.0 / (fan_in + fan_out))
    return jax.random.uniform(
        key, (fan_in, fan_out), dtype=jnp.float32, minval=-bound, maxval=bound)


def fold_first_linear(table, w1, b1):
    # table[t] @ W1 + b1 == (table @ W1 + b1)[t].  Tiny T x d_model x dim GEMM,
    # recomputed after each optimizer step; free at inference.
    return table @ w1 + b1                               # (T, dim)


# Pure-JAX, unfused, module-faithful reference for verification.
def time_embedding_ref(t, table, w1, b1, w2, b2):
    emb = jnp.take(table, t, axis=0)
    h = emb @ w1 + b1
    h = h * jax.nn.sigmoid(h)
    return h @ w2 + b2


if __name__ == "__main__":
    # dim multiple of 128 -> lane-dense output path.
    T, d_model, dim = 32, 64, 128
    batch = 8

    key = jax.random.PRNGKey(0)
    k_t, k_w1, k_w2 = jax.random.split(key, 3)

    table = make_sinusoidal_table(T, d_model)            # Embedding.from_pretrained
    w1 = xavier_uniform(k_w1, d_model, dim)              # Linear(d_model, dim)
    b1 = jnp.zeros((dim,), jnp.float32)
    w2 = xavier_uniform(k_w2, dim, dim)                  # Linear(dim, dim)
    b2 = jnp.zeros((dim,), jnp.float32)

    t = jax.random.randint(k_t, (batch,), 0, T, dtype=jnp.int32)

    h_table = fold_first_linear(table, w1, b1)           # one-time precompute

    out = time_embedding_forward(t, h_table, w2, b2)
    out = jax.block_until_ready(out)

    ref = time_embedding_ref(t, table, w1, b1, w2, b2)
    assert out.shape == (batch, dim)
    assert jnp.allclose(out, ref, atol=2e-4, rtol=2e-4), "f32 kernel mismatch vs reference"

    # Optional bf16-MXU-input path for the second matmul (v6e/v7x native bf16 MXU).
    out_bf16 = jax.block_until_ready(
        time_embedding_forward(t, h_table, w2, b2, matmul_dtype=jnp.bfloat16))
    assert jnp.allclose(out_bf16, ref, atol=1e-1, rtol=1e-1), "bf16 kernel mismatch vs reference"

    print("KERNEL_OK")
</pallas_src>

<mosaic_0001>
module attributes {stable_mosaic.version = 11 : i64} {
  func.func @_time_embedding_kernel(%arg0: i32, %arg1: memref<8x1xi32, #tpu.memory_space<vmem>>, %arg2: memref<32x128xf32, #tpu.memory_space<vmem>>, %arg3: memref<128x128xf32, #tpu.memory_space<vmem>>, %arg4: memref<1x128xf32, #tpu.memory_space<vmem>>, %arg5: memref<8x128xf32, #tpu.memory_space<vmem>>) attributes {dimension_semantics = [#tpu.dimension_semantics<parallel>], iteration_bounds = array<i64: 1>, scalar_prefetch = 0 : i64, scratch_operands = 0 : i64, tpu.core_type = #tpu.core_type<tc>, window_params = [{transform_indices = @transform_0, window_bounds = array<i64: 8, 1>}, {pipeline_mode = #tpu.pipeline_mode<synchronous>, transform_indices = @transform_1, window_bounds = array<i64: 32, 128>}, {pipeline_mode = #tpu.pipeline_mode<synchronous>, transform_indices = @transform_2, window_bounds = array<i64: 128, 128>}, {pipeline_mode = #tpu.pipeline_mode<synchronous>, transform_indices = @transform_3, window_bounds = array<i64: 1, 128>}, {transform_indices = @transform_4, window_bounds = array<i64: 8, 128>}]} {
    %0 = tpu.iota {dimensions = array<i32: 1>} : vector<8x32xi32>
    %c0 = arith.constant 0 : index
    %c0_0 = arith.constant 0 : index
    %1 = vector.load %arg1[%c0, %c0_0] : memref<8x1xi32, #tpu.memory_space<vmem>>, vector<8x1xi32>
    %2 = vector.broadcast %1 : vector<8x1xi32> to vector<8x32xi32>
    %3 = arith.cmpi eq, %0, %2 : vector<8x32xi32>
    %4 = arith.extui %3 : vector<8x32xi1> to vector<8x32xi32>
    %5 = arith.sitofp %4 : vector<8x32xi32> to vector<8x32xf32>
    %c0_1 = arith.constant 0 : index
    %c0_2 = arith.constant 0 : index
    %6 = vector.load %arg2[%c0_1, %c0_2] : memref<32x128xf32, #tpu.memory_space<vmem>>, vector<32x128xf32>
    %cst = arith.constant dense<0.000000e+00> : vector<8x128xf32>
    %7 = tpu.matmul %5, %6, %cst {dimension_numbers = #tpu.dot_dimension_numbers<[1], [0], [0], [1], [0, 0, 1, 1], [], []>} : vector<8x32xf32>, vector<32x128xf32>, vector<8x128xf32> -> vector<8x128xf32>
    %8 = arith.negf %7 : vector<8x128xf32>
    %9 = math.exp %8 : vector<8x128xf32>
    %cst_3 = arith.constant 1.000000e+00 : f32
    %10 = vector.broadcast %cst_3 : f32 to vector<8x128xf32>
    %11 = arith.addf %10, %9 : vector<8x128xf32>
    %12 = arith.divf %10, %11 : vector<8x128xf32>
    %13 = arith.mulf %7, %12 : vector<8x128xf32>
    %c0_4 = arith.constant 0 : index
    %c0_5 = arith.constant 0 : index
    %14 = vector.load %arg3[%c0_4, %c0_5] : memref<128x128xf32, #tpu.memory_space<vmem>>, vector<128x128xf32>
    %cst_6 = arith.constant dense<0.000000e+00> : vector<8x128xf32>
    %15 = tpu.matmul %13, %14, %cst_6 {dimension_numbers = #tpu.dot_dimension_numbers<[1], [0], [0], [1], [0, 0, 1, 1], [], []>} : vector<8x128xf32>, vector<128x128xf32>, vector<8x128xf32> -> vector<8x128xf32>
    %c0_7 = arith.constant 0 : index
    %c0_8 = arith.constant 0 : index
    %16 = vector.load %arg4[%c0_7, %c0_8] : memref<1x128xf32, #tpu.memory_space<vmem>>, vector<1x128xf32>
    %17 = vector.broadcast %16 : vector<1x128xf32> to vector<8x128xf32>
    %18 = arith.addf %15, %17 : vector<8x128xf32>
    %c0_9 = arith.constant 0 : index
    %c0_10 = arith.constant 0 : index
    %19 = vector.load %arg5[%c0_9, %c0_10] : memref<8x128xf32, #tpu.memory_space<vmem>>, vector<8x128xf32>
    tpu.vector_store %arg5[%c0_9, %c0_10], %18 {strides = array<i32>} : memref<8x128xf32, #tpu.memory_space<vmem>>, vector<8x128xf32>,
    return
  }
  func.func @transform_0(%arg0: i32) -> (i32, i32) {
    %c0_i32 = arith.constant 0 : i32
    %c0_i32_0 = arith.constant 0 : i32
    return %arg0, %c0_i32 : i32, i32
  }
  func.func @transform_1(%arg0: i32) -> (i32, i32) {
    %c0_i32 = arith.constant 0 : i32
    %c0_i32_0 = arith.constant 0 : i32
    %c0_i32_1 = arith.constant 0 : i32
    return %c0_i32, %c0_i32_0 : i32, i32
  }
  func.func @transform_2(%arg0: i32) -> (i32, i32) {
    %c0_i32 = arith.constant 0 : i32
    %c0_i32_0 = arith.constant 0 : i32
    %c0_i32_1 = arith.constant 0 : i32
    return %c0_i32, %c0_i32_0 : i32, i32
  }
  func.func @transform_3(%arg0: i32) -> (i32, i32) {
    %c0_i32 = arith.constant 0 : i32
    %c0_i32_0 = arith.constant 0 : i32
    %c0_i32_1 = arith.constant 0 : i32
    return %c0_i32, %c0_i32_0 : i32, i32
  }
  func.func @transform_4(%arg0: i32) -> (i32, i32) {
    %c0_i32 = arith.constant 0 : i32
    %c0_i32_0 = arith.constant 0 : i32
    return %arg0, %c0_i32 : i32, i32
  }
}

</mosaic_0001>

<bundles_post_ra>
// kernel: tpu_custom_call.1
= control target key start
LH: loop header
LB: loop body
LE: loop exit
PB: predicated region body
PF: predicated region fallthrough
CT: control target
= control target key end

     0   :  { %9 = vsyncpa [#allocation3], 0  ;;  %s307_s0 = inlined_call_operand.vmem [shape: s32[8,1], index: 0, kind: input, shape index: {}]   ;;  %s308_s1 = inlined_call_operand.hbm [shape: f32[32,128], index: 1, kind: input, shape index: {}]   ;;  %s309_s2 = inlined_call_operand.hbm [shape: f32[128,128], index: 2, kind: input, shape index: {}]   ;;  %s310_s3 = inlined_call_operand.vmem [shape: f32[1,128], index: 3, kind: input, shape index: {}]   ;;  %s311_s4 = inlined_call_operand.hbm [shape: f32[8,128], index: 4, kind: output, shape index: {}]  }
   0x1   :  { %10 = vsyncpa [#allocation6], 0 }
   0x2   :  { %11 = vsyncpa [#allocation4], 0  ;;  %s18_s17 = sshll.u32 %s308_s1, 4  ;;  %s260_s18 = smov [#allocation2]   ;;  %s19_s17 = int_to_ptr.hbm [resolvable:$true] %s18_s17 }
   0x3   :  { %s20_s19 = sshll.u32 %s260_s18, 4  ;;  %s31_s22 = sshll.u32 %s309_s2, 4  ;;  %s21_s19 = int_to_ptr.vmem [resolvable:$true] %s20_s19  ;;  %s32_s22 = int_to_ptr.hbm [resolvable:$true] %s31_s22 }
   0x4   :  { %s261_s23 = smov 128   ;;  %s262_s24 = smov 8  }
   0x5   :  { %26 = dma.hbm_to_vmem [thread:$0]  %s19_s17, 512, %s21_s19, [#allocation3], %s261_s23, %s261_s23, %s262_s24  }
   0x6   :  { %s263_s25 = smov [#allocation5]  }
   0x7   :  { %s33_s26 = sshll.u32 %s263_s25, 4  ;;  %s34_s26 = int_to_ptr.vmem [resolvable:$true] %s33_s26 }
   0x8   :  { %39 = dma.hbm_to_vmem [thread:$0]  %s32_s22, 2048, %s34_s26, [#allocation6], %s261_s23, %s261_s23, %s262_s24  }
   0x9   :  { %254 = dma.done.wait [#allocation3], 512  }
   0xa   :  { %255 = vsyncadd [#allocation3], 4294966784 }
   0xb   :  { %256 = dma.done.wait [#allocation6], 2048  }
   0xc   :  { %257 = vsyncadd [#allocation6], 4294965248  ;;  %v264_v0 = vmov 0   ;;  %v52_v1 = vld [vmem:[%s307_s0] sm:$0xff]  ;;  %v62_v2 = vld [vmem:[#allocation2 + $0x18] sm:$0xff]  ;;  %v50_v6 = vlaneseq  ;;  %vm63_vm0 = vcmask 261120  }
   0xd   :  { %176 = vset.pattern.permute.xlu0 %v264_v0  ;;  %v61_v3 = vld [vmem:[#allocation2 + $0x10] sm:$0xff]  ;;  %79 = vmatpush.msra.mxu0 %v62_v2  ;;  %v60_v4 = vld [vmem:[#allocation2 + $0x8] sm:$0xff]  ;;  %v59_v5 = vld [vmem:[#allocation2] sm:$0xff]  ;;  %v265_v9 = vmov 0.0   ;;  %s266_s28 = smov [#allocation7]   ;;  %s155_s6 = sshll.u32 %s311_s4, 4  ;;  %s156_s6 = int_to_ptr.hbm [resolvable:$true] %s155_s6 }
   0xe   :  { %54 = vperm.xlu0 %176, %v52_v1   ;;  %v51_v7 = vand.u32 127, %v50_v6  ;;  %v122_v11 = vld [vmem:[#allocation5 + $0x78] sm:$0xff]  ;;  %v121_v12 = vld [vmem:[#allocation5 + $0x70] sm:$0xff]  ;;  %v120_v13 = vld [vmem:[#allocation5 + $0x68] sm:$0xff]  ;;  %s153_s29 = sshll.u32 %s266_s28, 4  ;;  %s154_s29 = int_to_ptr.vmem [resolvable:$true] %s153_s29 }
   0xf   :  { %80 = vmatpush.msra.mxu0 %v61_v3  ;;  %127 = vmatpush.msra.mxu1 %v122_v11  ;;  %v119_v14 = vld [vmem:[#allocation5 + $0x60] sm:$0xff]  ;;  %v118_v15 = vld [vmem:[#allocation5 + $0x58] sm:$0xff]  ;;  %v117_v16 = vld [vmem:[#allocation5 + $0x50] sm:$0xff] }
  0x10   :  { %v116_v17 = vld [vmem:[#allocation5 + $0x48] sm:$0xff]  ;;  %v115_v18 = vld [vmem:[#allocation5 + $0x40] sm:$0xff]  ;;  %v114_v19 = vld [vmem:[#allocation5 + $0x38] sm:$0xff] }
  0x11   :  { %81 = vmatpush.msra.mxu0 %v60_v4  ;;  %128 = vmatpush.msra.mxu1 %v121_v12  ;;  %v113_v20 = vld [vmem:[#allocation5 + $0x30] sm:$0xff]  ;;  %v112_v21 = vld [vmem:[#allocation5 + $0x28] sm:$0xff]  ;;  %v111_v22 = vld [vmem:[#allocation5 + $0x20] sm:$0xff] }
  0x12   :  { %v110_v23 = vld [vmem:[#allocation5 + $0x18] sm:$0xff]  ;;  %v109_v24 = vld [vmem:[#allocation5 + $0x10] sm:$0xff]  ;;  %v108_v25 = vld [vmem:[#allocation5 + $0x8] sm:$0xff] }
  0x13   :  { %82 = vmatpush.msra.mxu0 %v59_v5  ;;  %129 = vmatpush.msra.mxu1 %v120_v13  ;;  %v107_v26 = vld [vmem:[#allocation5] sm:$0xff] }
  0x14   :  { %v177_v42 = vld [vmem:[%s310_s3] ss:$0 sm:$0xff] }
  0x15   :  { %130 = vmatpush.msra.mxu1 %v119_v14 }
  0x17   :  { %131 = vmatpush.msra.mxu1 %v118_v15 }
  0x19   :  { %132 = vmatpush.msra.mxu1 %v117_v16 }
  0x1b   :  { %133 = vmatpush.msra.mxu1 %v116_v17 }
  0x1d   :  { %134 = vmatpush.msra.mxu1 %v115_v18 }
  0x1f   :  { %135 = vmatpush.msra.mxu1 %v114_v19 }
  0x21   :  { %136 = vmatpush.msra.mxu1 %v113_v20 }
  0x23   :  { %137 = vmatpush.msra.mxu1 %v112_v21 }
  0x25   :  { %138 = vmatpush.msra.mxu1 %v111_v22 }
  0x27   :  { %139 = vmatpush.msra.mxu1 %v110_v23 }
  0x29   :  { %140 = vmatpush.msra.mxu1 %v109_v24 }
  0x2b   :  { %141 = vmatpush.msra.mxu1 %v108_v25 }
  0x2d   :  { %142 = vmatpush.msra.mxu1 %v107_v26 }
  0x80   :  { %v55_v8 = vpop.permute.xlu0 %54 }
  0x81   :  { %vm56_vm1 = vcmp.eq.s32.totalorder %v51_v7, %v55_v8 }
  0x82   :  { %v166_v10 = vsel %vm56_vm1, 1.0, %v265_v9 }
  0x83   :  { %167 = vmatmul.msk.f32.vlgmr.msra.gmra.mxu0 %vm63_vm0, %v166_v10 }
 0x100   :  { %v84_v27 = vpop.f32.mrf.mxu0 }
 0x101   :  { %v168_v28 = vmul.f32 -1.442695, %v84_v27 }
 0x103   :  { %178 = vpow2.f32 %v168_v28 }
 0x109   :  { %v179_v29 = vpop.eup %178 }
 0x10a   :  { %v90_v30 = vadd.f32 1.0, %v179_v29 }
 0x10c   :  { %180 = vrcp.f32 %v90_v30  ;;  %v102_v34 = vand.u32 2147483648, %v90_v30  ;;  %v100_v36 = vand.u32 2147483647, %v90_v30  ;;  %vm96_vm3 = vweird.f32 %v90_v30 }
 0x10e   :  { %v103_v38 = vor.u32 1.1754944e-38, %v102_v34  ;;  %vm101_vm5 = vcmp.eq.f32.partialorder %v100_v36, 8.507059e+37 }
 0x112   :  { %v181_v31 = vpop.eup %180 }
 0x113   :  { %v92_v32 = vmul.f32 %v181_v31, %v90_v30  ;;  %vm97_vm2 = vweird.f32 %v181_v31 }
 0x114   :  { %vm98_vm4 = vmor %vm96_vm3, %vm97_vm2 }
 0x115   :  { %v93_v33 = vsub.f32 1.0, %v92_v32 }
 0x117   :  { %v94_v35 = vmul.f32 %v181_v31, %v93_v33 }
 0x119   :  { %v95_v37 = vadd.f32 %v181_v31, %v94_v35 }
 0x11b   :  { %v99_v39 = vsel %vm98_vm4, %v181_v31, %v95_v37 }
 0x11c   :  { %v104_v40 = vsel %vm101_vm5, %v103_v38, %v99_v39 }
 0x11d   :  { %v106_v41 = vmul.f32 %v104_v40, %v84_v27 }
 0x11f   :  { %143 = vmatmul.f32.vlgmr.msra.gmra.mxu1 %v106_v41 }
 0x19c   :  { %v144_v43 = vpop.f32.mrf.mxu1 }
 0x19d   :  { %v145_v44 = vadd.f32 %v177_v42, %v144_v43 }
 0x19f   :  { %147 = vst [vmem:[#allocation7] sm:$0xff] %v145_v44 }
 0x1a0   :  { %158 = dma.vmem_to_hbm [thread:$0]  %s154_s29, 128, %s156_s6, [#allocation4]  }
 0x1a1   :  { %258 = dma.done.wait [#allocation4], 128  }
 0x1a2   :  { %259 = vsyncadd [#allocation4], 4294967168 }
 0x1a3   :  { %163 = vsyncpa [#allocation3], 1 }
 0x1a4   :  { %164 = vsyncpa [#allocation6], 1 }
 0x1a5   :  { %165 = vsyncpa [#allocation4], 1 }

</bundles_post_ra>
